<compile_context>
chip_gen: v7x
topology: tpu7x:2x2x1
jax: 0.10.0
libtpu: 0.0.40
codegen_flags: <defaults>
</compile_context>

<pallas_src>
import functools

import jax
import jax.numpy as jnp
from jax import lax
from jax.experimental import pallas as pl
from jax.experimental.pallas import tpu as pltpu


def _round_up(x, m):
    return ((x + m - 1) // m) * m


def _round_down(x, m):
    return (x // m) * m


def _vmem_capacity_bytes():
    """Per-core VMEM capacity; conservative fallback if the query is unavailable."""
    try:
        return int(pltpu.get_tpu_info().vmem_capacity_bytes)
    except Exception:
        return 64 * 1024 * 1024  # v7x per-core VMEM (smallest of v5e/v6e/v7x)


def _gloss_kernel(x_ref, o_ref, acc_ref, *, class_axis, batch_size, batch_tile):
    """One grid step: a batch tile of logits -> accumulate (1 - sqrt(sum p^2))."""
    c = pl.program_id(0)          # core-split index ("parallel", v7x megacore)
    j = pl.program_id(1)          # streaming step within this split ("arbitrary")

    @pl.when(j == 0)
    def _():
        acc_ref[...] = jnp.zeros_like(acc_ref)

    x = x_ref[...].astype(jnp.float32)

    # Numerically-stable softmax statistics without normalizing the full tile:
    #   sum(softmax(x)^2) = sum(e^2) / sum(e)^2,  e = exp(x - max(x))
    m = jnp.max(x, axis=class_axis, keepdims=True)
    e = jnp.exp(x - m)
    s1 = jnp.sum(e, axis=class_axis, keepdims=True)
    s2 = jnp.sum(e * e, axis=class_axis, keepdims=True)
    inv = pl.reciprocal(s1, approx=False)      # reduced tensor only; exact f32
    pyx = s2 * inv * inv
    per = 1.0 - jnp.sqrt(pyx)                  # (1, TN) lane-dense or (TM, 1)

    # Mask batch positions past N (ragged last tile / over-subscribed split).
    batch_axis = 1 - class_axis
    start = (c * pl.num_programs(1) + j) * batch_tile
    pos = start + lax.broadcasted_iota(jnp.int32, per.shape, batch_axis)
    per = jnp.where(pos < batch_size, per, 0.0)

    # Vector-wise accumulation; defer the cross-lane reduce to the last step.
    acc_ref[...] += per

    @pl.when(j == pl.num_programs(1) - 1)
    def _():
        o_ref[...] = jnp.zeros_like(o_ref) + jnp.sum(acc_ref[...])


def gloss_pallas(preds, *, num_core_splits=2, max_batch_tile=None):
    """preds: (N, C) logits (f32 or bf16).  Returns the scalar f32 gLoss."""
    N, C = preds.shape
    itemsize = jnp.dtype(preds.dtype).itemsize

    vmem_cap = _vmem_capacity_bytes()
    input_budget = vmem_cap // 4                        # double-buffered input stream
    vmem_limit = min(vmem_cap // 2, 48 * 1024 * 1024)   # leave headroom on v7x

    lane_dense = C < 128
    if lane_dense:
        # Put the batch on the 128-wide lane axis; classes ride the sublanes.
        x = preds.T                                     # (C, N)
        bytes_per_sample = C * itemsize
        cap_tile = input_budget // (2 * bytes_per_sample)
        if max_batch_tile is not None:
            cap_tile = min(cap_tile, max_batch_tile)
        tile = max(128, min(_round_down(cap_tile, 128), _round_up(N, 128)))
        if tile >= N:                                   # single full-extent block
            tile = N
        block_shape = (C, tile)
        acc_shape = (1, tile)
        class_axis = 0
    else:
        # Classes are already lane-dense in the natural row-major layout.
        x = preds                                       # (N, C)
        sub = 8 * max(1, 4 // itemsize)                 # 8 rows f32, 16 rows bf16
        bytes_per_sample = C * itemsize
        cap_tile = input_budget // (2 * bytes_per_sample)
        if max_batch_tile is not None:
            cap_tile = min(cap_tile, max_batch_tile)
        tile = max(sub, min(_round_down(cap_tile, sub), _round_up(N, sub), 1024))
        if tile >= N:                                   # single full-extent block
            tile = N
        block_shape = (tile, C)
        acc_shape = (tile, 1)
        class_axis = 1

    nblocks = pl.cdiv(N, tile)
    splits = max(1, min(num_core_splits, nblocks))
    steps = pl.cdiv(nblocks, splits)
    last_block = nblocks - 1

    if lane_dense:
        def in_map(c, j):
            return (0, jnp.minimum(c * steps + j, last_block))
    else:
        def in_map(c, j):
            return (jnp.minimum(c * steps + j, last_block), 0)

    kernel = functools.partial(
        _gloss_kernel, class_axis=class_axis, batch_size=N, batch_tile=tile)

    partials = pl.pallas_call(
        kernel,
        out_shape=jax.ShapeDtypeStruct((splits, 8, 128), jnp.float32),
        grid_spec=pltpu.PrefetchScalarGridSpec(
            num_scalar_prefetch=0,
            grid=(splits, steps),
            in_specs=[pl.BlockSpec(block_shape, in_map)],
            out_specs=pl.BlockSpec((1, 8, 128), lambda c, j: (c, 0, 0)),
            scratch_shapes=[pltpu.VMEM(acc_shape, jnp.float32)],
        ),
        compiler_params=pltpu.CompilerParams(
            dimension_semantics=("parallel", "arbitrary"),
            vmem_limit_bytes=vmem_limit,
        ),
    )(x)
    # Each split broadcasts its partial sum over its (8, 128) output block;
    # pick one element per split and reduce.
    return partials[:, 0, 0].sum()


def gloss_reference(preds):
    p = jax.nn.softmax(preds.astype(jnp.float32), axis=1)
    pyx = jnp.sum(p * p, axis=1)
    return jnp.sum(1.0 - jnp.sqrt(pyx), axis=0)


def _check(preds, **kwargs):
    loss = jax.block_until_ready(gloss_pallas(preds, **kwargs))
    ref = gloss_reference(preds)
    assert jnp.allclose(loss, ref, atol=1e-4, rtol=1e-4), (loss, ref)


if __name__ == "__main__":
    key = jax.random.PRNGKey(0)

    # Small classifier logits (batch=16, classes=8): lane-dense (transposed) path.
    preds = jax.random.normal(key, (16, 8), dtype=jnp.float32)
    _check(preds)

    # Ragged batch with a wide class axis: row-layout path + edge masking.
    preds_wide = jax.random.normal(jax.random.fold_in(key, 1), (37, 256),
                                   dtype=jnp.float32)
    _check(preds_wide)

    # Longer batch with a forced small tile: exercises multi-step accumulation,
    # the ragged last block, and the clamped over-subscribed core split.
    preds_long = jax.random.normal(jax.random.fold_in(key, 2), (600, 8),
                                   dtype=jnp.float32)
    _check(preds_long, max_batch_tile=128)

    print("KERNEL_OK")
</pallas_src>

<mosaic_0001>
module attributes {stable_mosaic.version = 11 : i64} {
  func.func @_gloss_kernel(%arg0: i32, %arg1: i32, %arg2: memref<8x16xf32, #tpu.memory_space<vmem>>, %arg3: memref<1x8x128xf32, #tpu.memory_space<vmem>>, %arg4: memref<1x16xf32, #tpu.memory_space<vmem>>) attributes {dimension_semantics = [#tpu.dimension_semantics<parallel>, #tpu.dimension_semantics<arbitrary>], iteration_bounds = array<i64: 1, 1>, scalar_prefetch = 0 : i64, scratch_operands = 1 : i64, tpu.core_type = #tpu.core_type<tc>, window_params = [{transform_indices = @transform_0, window_bounds = array<i64: 8, 16>}, {transform_indices = @transform_1, window_bounds = array<i64: 1, 8, 128>}]} {
    %c0_i32 = arith.constant 0 : i32
    %0 = arith.cmpi eq, %arg1, %c0_i32 : i32
    %1 = arith.extui %0 : i1 to i32
    %c0_i32_0 = arith.constant 0 : i32
    %2 = arith.cmpi ne, %1, %c0_i32_0 : i32
    scf.if %2 {
      %cst_13 = arith.constant 0.000000e+00 : f32
      %36 = vector.broadcast %cst_13 : f32 to vector<1x16xf32>
      %c0_14 = arith.constant 0 : index
      %c0_15 = arith.constant 0 : index
      %37 = vector.load %arg4[%c0_14, %c0_15] : memref<1x16xf32, #tpu.memory_space<vmem>>, vector<1x16xf32>
      tpu.vector_store %arg4[%c0_14, %c0_15], %36 {strides = array<i32>} : memref<1x16xf32, #tpu.memory_space<vmem>>, vector<1x16xf32>,
    } else {
    }
    %c0 = arith.constant 0 : index
    %c0_1 = arith.constant 0 : index
    %3 = vector.load %arg2[%c0, %c0_1] : memref<8x16xf32, #tpu.memory_space<vmem>>, vector<8x16xf32>
    %cst = arith.constant dense<0xFF800000> : vector<16xf32>
    %4 = vector.multi_reduction <maximumf>, %3, %cst [0] : vector<8x16xf32> to vector<16xf32>
    %5 = vector.shape_cast %4 : vector<16xf32> to vector<1x16xf32>
    %6 = vector.broadcast %5 : vector<1x16xf32> to vector<8x16xf32>
    %7 = arith.subf %3, %6 : vector<8x16xf32>
    %8 = math.exp %7 : vector<8x16xf32>
    %cst_2 = arith.constant dense<0.000000e+00> : vector<16xf32>
    %9 = vector.multi_reduction <add>, %8, %cst_2 [0] : vector<8x16xf32> to vector<16xf32>
    %10 = vector.shape_cast %9 : vector<16xf32> to vector<1x16xf32>
    %11 = arith.mulf %8, %8 : vector<8x16xf32>
    %cst_3 = arith.constant dense<0.000000e+00> : vector<16xf32>
    %12 = vector.multi_reduction <add>, %11, %cst_3 [0] : vector<8x16xf32> to vector<16xf32>
    %13 = vector.shape_cast %12 : vector<16xf32> to vector<1x16xf32>
    %14 = tpu.reciprocal %10 : vector<1x16xf32> -> vector<1x16xf32>
    %15 = arith.mulf %13, %14 : vector<1x16xf32>
    %16 = arith.mulf %15, %14 : vector<1x16xf32>
    %17 = math.sqrt %16 : vector<1x16xf32>
    %cst_4 = arith.constant 1.000000e+00 : f32
    %18 = vector.broadcast %cst_4 : f32 to vector<1x16xf32>
    %19 = arith.subf %18, %17 : vector<1x16xf32>
    %c1_i32 = arith.constant 1 : i32
    %20 = arith.muli %arg0, %c1_i32 : i32
    %21 = arith.addi %20, %arg1 : i32
    %c16_i32 = arith.constant 16 : i32
    %22 = arith.muli %21, %c16_i32 : i32
    %23 = tpu.iota {dimensions = array<i32: 1>} : vector<1x16xi32>
    %24 = vector.broadcast %22 : i32 to vector<1x16xi32>
    %25 = arith.addi %24, %23 : vector<1x16xi32>
    %c16_i32_5 = arith.constant 16 : i32
    %26 = vector.broadcast %c16_i32_5 : i32 to vector<1x16xi32>
    %27 = arith.cmpi slt, %25, %26 : vector<1x16xi32>
    %cst_6 = arith.constant 0.000000e+00 : f32
    %28 = vector.broadcast %cst_6 : f32 to vector<1x16xf32>
    %29 = arith.select %27, %19, %28 : vector<1x16xi1>, vector<1x16xf32>
    %c0_7 = arith.constant 0 : index
    %c0_8 = arith.constant 0 : index
    %30 = vector.load %arg4[%c0_7, %c0_8] : memref<1x16xf32, #tpu.memory_space<vmem>>, vector<1x16xf32>
    %31 = arith.addf %30, %29 : vector<1x16xf32>
    %c0_9 = arith.constant 0 : index
    %c0_10 = arith.constant 0 : index
    %32 = vector.load %arg4[%c0_9, %c0_10] : memref<1x16xf32, #tpu.memory_space<vmem>>, vector<1x16xf32>
    tpu.vector_store %arg4[%c0_9, %c0_10], %31 {strides = array<i32>} : memref<1x16xf32, #tpu.memory_space<vmem>>, vector<1x16xf32>,
    %c0_i32_11 = arith.constant 0 : i32
    %33 = arith.cmpi eq, %arg1, %c0_i32_11 : i32
    %34 = arith.extui %33 : i1 to i32
    %c0_i32_12 = arith.constant 0 : i32
    %35 = arith.cmpi ne, %34, %c0_i32_12 : i32
    scf.if %35 {
      %cst_13 = arith.constant 0.000000e+00 : f32
      %36 = vector.broadcast %cst_13 : f32 to vector<1x8x128xf32>
      %c0_14 = arith.constant 0 : index
      %c0_15 = arith.constant 0 : index
      %37 = vector.load %arg4[%c0_14, %c0_15] : memref<1x16xf32, #tpu.memory_space<vmem>>, vector<1x16xf32>
      %38 = vector.shape_cast %37 : vector<1x16xf32> to vector<1x1x16xf32>
      %cst_16 = arith.constant dense<0.000000e+00> : vector<1xf32>
      %39 = vector.multi_reduction <add>, %38, %cst_16 [1, 2] : vector<1x1x16xf32> to vector<1xf32>
      %40 = vector.shape_cast %39 : vector<1xf32> to vector<1x1x1xf32>
      %41 = vector.extract %40[0, 0, 0] : f32 from vector<1x1x1xf32>
      %42 = vector.broadcast %41 : f32 to vector<1x8x128xf32>
      %43 = arith.addf %36, %42 : vector<1x8x128xf32>
      %c0_17 = arith.constant 0 : index
      %c0_18 = arith.constant 0 : index
      %c0_19 = arith.constant 0 : index
      %44 = vector.load %arg3[%c0_17, %c0_18, %c0_19] : memref<1x8x128xf32, #tpu.memory_space<vmem>>, vector<1x8x128xf32>
      tpu.vector_store %arg3[%c0_17, %c0_18, %c0_19], %43 {strides = array<i32>} : memref<1x8x128xf32, #tpu.memory_space<vmem>>, vector<1x8x128xf32>,
    } else {
    }
    return
  }
  func.func @transform_0(%arg0: i32, %arg1: i32) -> (i32, i32) {
    %c1_i32 = arith.constant 1 : i32
    %0 = arith.muli %arg0, %c1_i32 : i32
    %1 = arith.addi %0, %arg1 : i32
    %c0_i32 = arith.constant 0 : i32
    %2 = arith.minsi %1, %c0_i32 : i32
    %c0_i32_0 = arith.constant 0 : i32
    %c0_i32_1 = arith.constant 0 : i32
    return %c0_i32_0, %2 : i32, i32
  }
  func.func @transform_1(%arg0: i32, %arg1: i32) -> (i32, i32, i32) {
    %c0_i32 = arith.constant 0 : i32
    %c0_i32_0 = arith.constant 0 : i32
    %c0_i32_1 = arith.constant 0 : i32
    return %arg0, %c0_i32, %c0_i32_0 : i32, i32, i32
  }
}

</mosaic_0001>

<bundles_post_ra>
// kernel: tpu_custom_call.1
= control target key start
LH: loop header
LB: loop body
LE: loop exit
PB: predicated region body
PF: predicated region fallthrough
CT: control target
= control target key end

     0   :  { %6 = vsyncpa [#allocation4], 0  ;;  %s221_s0 = inlined_call_operand.hbm [shape: f32[8,16], index: 0, kind: input, shape index: {}]   ;;  %s222_s1 = inlined_call_operand.hbm [shape: f32[1,8,128], index: 1, kind: output, shape index: {}]  }
   0x1   :  { %7 = vsyncpa [#allocation5], 0  ;;  %s178_s6 = smov [#allocation3]   ;;  %s130_s10 = scalar_lea.hbm %s221_s0, 128 }
   0x2   :  { %s19_s7 = sshll.u32 %s178_s6, 4  ;;  %p131_p0 = scmp.ne.s32.totalorder %s221_s0, %s130_s10  ;;  %s20_s7 = int_to_ptr.vmem [resolvable:$true] %s19_s7 }
   0x3   :  { %p134_p1 = scmp.lt.u32.totalorder %s130_s10, %s221_s0 }
   0x5   :  { %p136_p2 = pnand %p134_p1, %p131_p0 }
   0x7   :  { %139 = shalt.err (!%p136_p2)
}
   0x8   :  { %s140_s15 = scalar_lea.vmem %s20_s7, 128  ;;  %p145_p4 = scmp.lt.s32.totalorder %s20_s7, %s20_s7 }
   0x9   :  { %p141_p3 = scmp.ne.s32.totalorder %s20_s7, %s140_s15  ;;  %p146_p5 = scmp.lt.s32.totalorder %s140_s15, %s140_s15 }
   0xb   :  { %p147_p6 = por %p146_p5, %p145_p4 }
   0xd   :  { %p148_p7 = pnand %p147_p6, %p141_p3 }
   0xf   :  { %151 = shalt.err (!%p148_p7)
}
  0x10   :  { %22 = dma.hbm_to_vmem [thread:$0]  %s221_s0, 128, %s20_s7, [#allocation4]  }
  0x11   :  { %174 = dma.done.wait [#allocation4], 128  }
  0x12   :  { %175 = vsyncadd [#allocation4], 4294967168  ;;  %vm33_vm0 = vcmask 122880   ;;  %v179_v0 = vmov 0.0   ;;  %vm36_vm1 = vcmask 130048   ;;  %v35_v1 = vld [vmem:[#allocation3] sm:$0xff]  ;;  %v75_v30 = vlaneseq }
  0x13   :  { %34 = vst.msk [vmem:[#allocation2] sm:$0x1] %vm33_vm0, %v179_v0  ;;  %v37_v2 = vsel %vm36_vm1, %v35_v1, -inf  ;;  %s180_s0 = smov [#allocation6]  }
  0x14   :  { %v38_v3 = vrot.slane %v37_v2, 4  ;;  %v76_v33 = vand.u32 127, %v75_v30  ;;  %s108_s18 = sshll.u32 %s180_s0, 4  ;;  %s109_s18 = int_to_ptr.vmem [resolvable:$true] %s108_s18 }
  0x15   :  { %s152_s20 = scalar_lea.vmem %s109_s18, 128  ;;  %p157_p9 = scmp.lt.s32.totalorder %s109_s18, %s109_s18 }
  0x16   :  { %v39_v4 = vmax.f32 %v37_v2, %v38_v3  ;;  %vm79_vm4 = vcmp.lt.s32.totalorder %v76_v33, 16  ;;  %p153_p8 = scmp.ne.s32.totalorder %s109_s18, %s152_s20  ;;  %p158_p10 = scmp.lt.s32.totalorder %s152_s20, %s152_s20 }
  0x18   :  { %v40_v5 = vrot.slane %v39_v4, 2  ;;  %p159_p11 = por %p158_p10, %p157_p9 }
  0x1a   :  { %v41_v6 = vmax.f32 %v39_v4, %v40_v5  ;;  %v81_v38 = vld [vmem:[#allocation2] sm:$0x1]  ;;  %p160_p12 = pnand %p159_p11, %p153_p8 }
  0x1c   :  { %v42_v7 = vrot.slane %v41_v6, 1 }
  0x1e   :  { %v43_v8 = vmax.f32 %v41_v6, %v42_v7 }
  0x20   :  { %v44_v9 = vsub.f32 %v35_v1, %v43_v8 }
  0x22   :  { %v45_v10 = vmul.f32 1.442695, %v44_v9 }
  0x24   :  { %124 = vpow2.f32 %v45_v10 }
  0x2e   :  { %v125_v11 = vpop.eup %124 }
  0x2f   :  { %v47_v12 = vsel %vm36_vm1, %v125_v11, 0.0  ;;  %v54_v13 = vmul.f32 %v125_v11, %v125_v11 }
  0x30   :  { %v48_v14 = vrot.slane %v47_v12, 4 }
  0x31   :  { %v55_v15 = vsel %vm36_vm1, %v54_v13, 0.0 }
  0x32   :  { %v49_v16 = vadd.f32 %v48_v14, %v47_v12  ;;  %v56_v17 = vrot.slane %v55_v15, 4 }
  0x34   :  { %v50_v18 = vrot.slane %v49_v16, 2  ;;  %v57_v19 = vadd.f32 %v56_v17, %v55_v15 }
  0x36   :  { %v51_v20 = vadd.f32 %v50_v18, %v49_v16  ;;  %v58_v21 = vrot.slane %v57_v19, 2 }
  0x38   :  { %v52_v22 = vrot.slane %v51_v20, 1  ;;  %v59_v24 = vadd.f32 %v58_v21, %v57_v19 }
  0x3a   :  { %v53_v23 = vadd.f32 %v52_v22, %v51_v20  ;;  %v60_v25 = vrot.slane %v59_v24, 1 }
  0x3c   :  { %126 = vrcp.f32 %v53_v23  ;;  %v61_v26 = vadd.f32 %v60_v25, %v59_v24 }
  0x46   :  { %v127_v27 = vpop.eup %126 }
  0x47   :  { %v63_v28 = vmul.f32 %v127_v27, %v61_v26 }
  0x49   :  { %v64_v29 = vmul.f32 %v127_v27, %v63_v28 }
  0x4b   :  { %128 = vrsqrt.f32 %v64_v29  ;;  %vm67_vm2 = vcmp.eq.f32.partialorder %v64_v29, inf  ;;  %v70_v32 = vand.u32 2147483648, %v64_v29  ;;  %vm69_vm3 = vcmp.eq.f32.partialorder %v64_v29, 0.0 }
  0x55   :  { %v129_v31 = vpop.eup %128 }
  0x56   :  { %v66_v34 = vmul.f32 %v129_v31, %v64_v29 }
  0x58   :  { %v68_v35 = vsel %vm67_vm2, %v64_v29, %v66_v34 }
  0x59   :  { %v71_v36 = vsel %vm69_vm3, %v70_v32, %v68_v35 }
  0x5a   :  { %v72_v37 = vsub.f32 1.0, %v71_v36 }
  0x5c   :  { %v80_v39 = vsel %vm79_vm4, %v72_v37, 0.0 }
  0x5d   :  { %v82_v40 = vadd.f32 %v81_v38, %v80_v39 }
  0x5f   :  { %84 = vst.msk [vmem:[#allocation2] sm:$0x1] %vm33_vm0, %v82_v40 }
  0x66   :  { %v88_v41 = vld [vmem:[#allocation2] sm:$0x1] }
  0x67   :  { %v89_v42 = vsel %vm33_vm0, %v88_v41, 0.0 }
  0x68   :  { %90 = vadd.xlane.f32.xlu0 %v89_v42 }
  0xf5   :  { %v91_v43 = vpop.xlane.xlu0 %90 }
  0xf6   :  { %v92_v44 = vrot.slane %v91_v43, 4 }
  0xf8   :  { %v93_v45 = vadd.f32 %v92_v44, %v91_v43 }
  0xfa   :  { %v94_v46 = vrot.slane %v93_v45, 2 }
  0xfc   :  { %v95_v47 = vadd.f32 %v94_v46, %v93_v45 }
  0xfe   :  { %v96_v48 = vrot.slane %v95_v47, 1 }
 0x100   :  { %v97_v49 = vadd.f32 %v96_v48, %v95_v47 }
 0x102   :  { %119 = vpush %v97_v49 }
 0x133   :  { %s120_s19 = spop %119 }
 0x134   :  { %v99_v50 = vstv %s120_s19 }
 0x135   :  { %101 = vst [vmem:[#allocation6] sm:$0xff] %v99_v50 }
 0x136   :  { %163 = shalt.err (!%p160_p12)
}
 0x137   :  { %s164_s23 = scalar_lea.hbm %s222_s1, 128 }
 0x138   :  { %p165_p13 = scmp.ne.s32.totalorder %s222_s1, %s164_s23  ;;  %p168_p0 = scmp.lt.u32.totalorder %s164_s23, %s222_s1 }
 0x13a   :  { %p170_p1 = pnand %p168_p0, %p165_p13 }
 0x13c   :  { %173 = shalt.err (!%p170_p1)
}
 0x13d   :  { %111 = dma.vmem_to_hbm [thread:$0]  %s109_s18, 128, %s222_s1, [#allocation5]  }
 0x13e   :  { %176 = dma.done.wait [#allocation5], 128  }
 0x13f   :  { %177 = vsyncadd [#allocation5], 4294967168 }
 0x140   :  { %115 = vsyncpa [#allocation4], 1 }
 0x141   :  { %116 = vsyncpa [#allocation5], 1 }

</bundles_post_ra>
